<compile_context>
chip_gen: v7x
topology: tpu7x:2x2x1
jax: 0.10.0
libtpu: 0.0.40
codegen_flags: <defaults>
</compile_context>

<pallas_src>
import jax
import jax.numpy as jnp
from jax.experimental import pallas as pl
from jax.experimental.pallas import tpu as pltpu


_SMALL_FAST_PATH_ELEMS = 64 * 1024      # below this, fused plain jnp is faster
_TARGET_BLOCK_ELEMS = 1024 * 1024       # ~4 MiB of f32 input per grid step
_ROW_MULT = 32                          # int8 output native (32, 128) tiling


def _threshold_kernel(x_ref, o_ref):
    # one VPU compare + narrowing cast; no select needed since result is 0/1
    o_ref[...] = (x_ref[...] < -2).astype(o_ref.dtype)


def _choose_lane_width(total):
    """Widest lane-dense last dim (multiple of 128) that divides `total`."""
    for w in (1024, 512, 256, 128):
        if total % w == 0:
            return w
    return None


def basenet_forward(x, out_dtype=jnp.int8):
    """Elementwise out = where(x < -2, 1, 0) for any shape/layout.

    Default out_dtype=int8 (bandwidth-optimal; values are only 0/1).
    Pass jnp.int32 if downstream code needs a wider integer.
    """
    orig_shape = x.shape
    total = x.size

    # Tiny / empty inputs: pallas_call overhead dominates and plain jnp fuses
    # with producers/consumers; this also guards total == 0.
    if total < _SMALL_FAST_PATH_ELEMS:
        return (x < -2).astype(out_dtype)

    lane = _choose_lane_width(total)
    if lane is None:
        # Ragged element count (not a multiple of 128).  The old pad+slice
        # route did ~3 HBM passes; a single fused XLA elementwise pass is
        # already at the HBM roofline for this op, so use it directly.
        return (x < -2).astype(out_dtype)

    rows = total // lane
    x2d = jnp.ravel(x).reshape(rows, lane)       # free metadata reshape

    # ~4 MiB f32 input per block; double-buffered (f32 in + int8 out) stays
    # ~10 MiB: under v5e's 16 MiB default scoped VMEM and well under
    # v6e/v7x's 32 MiB, so no per-generation code path / vmem_limit needed.
    target_rows = max(_ROW_MULT,
                      (_TARGET_BLOCK_ELEMS // lane // _ROW_MULT) * _ROW_MULT)

    if rows < 2 * _ROW_MULT:
        block_rows = rows                         # too small to split; 1 step
    else:
        # Always produce >= 2 (roughly balanced) grid steps so both v7x
        # TensorCores stream under dimension_semantics=("parallel",),
        # capped at ~4 MiB blocks for v5e/v7x VMEM.
        half = pl.cdiv(rows, 2)
        half_aligned = pl.cdiv(half, _ROW_MULT) * _ROW_MULT
        block_rows = min(target_rows, half_aligned)

    grid = (pl.cdiv(rows, block_rows),)           # partial last block is OK

    out2d = pl.pallas_call(
        _threshold_kernel,
        out_shape=jax.ShapeDtypeStruct((rows, lane), out_dtype),
        grid=grid,
        in_specs=[pl.BlockSpec((block_rows, lane), lambda i: (i, 0))],
        out_specs=pl.BlockSpec((block_rows, lane), lambda i: (i, 0)),
        compiler_params=pltpu.CompilerParams(
            dimension_semantics=("parallel",),
        ),
    )(x2d)

    return out2d.reshape(orig_shape)


if __name__ == "__main__":
    key = jax.random.PRNGKey(0)

    # 1) nominal small NCHW input from the module spec -> tiny fast path
    x_small = jax.random.normal(key, (2, 4, 16, 16), dtype=jnp.float32) * 3.0
    out_small = jax.block_until_ready(basenet_forward(x_small))
    ref_small = (x_small < -2).astype(out_small.dtype)
    assert out_small.shape == x_small.shape
    assert bool(jnp.all(out_small == ref_small))
    assert bool(jnp.all((out_small == 0) | (out_small == 1)))

    # 2) larger aligned input that exercises the Pallas kernel (2 grid steps)
    x_big = jax.random.normal(jax.random.PRNGKey(0), (2, 4, 128, 128),
                              dtype=jnp.float32) * 3.0
    out_big = jax.block_until_ready(basenet_forward(x_big))
    ref_big = (x_big < -2).astype(out_big.dtype)
    assert out_big.shape == x_big.shape
    assert bool(jnp.all(out_big == ref_big))
    assert bool(jnp.all((out_big == 0) | (out_big == 1)))

    # 3) wider-integer output (closer to PyTorch's int) gives identical values
    out32 = jax.block_until_ready(basenet_forward(x_big, out_dtype=jnp.int32))
    assert out32.dtype == jnp.int32
    assert bool(jnp.all(out32 == ref_big.astype(jnp.int32)))

    # 4) ragged element count -> single fused XLA pass fallback
    x_ragged = jax.random.normal(jax.random.PRNGKey(1), (3, 5, 7),
                                 dtype=jnp.float32) * 3.0
    out_r = jax.block_until_ready(basenet_forward(x_ragged))
    assert out_r.shape == x_ragged.shape
    assert bool(jnp.all(out_r == (x_ragged < -2).astype(out_r.dtype)))

    print("KERNEL_OK")
</pallas_src>

<mosaic_0001>
module attributes {stable_mosaic.version = 11 : i64} {
  func.func @_threshold_kernel(%arg0: i32, %arg1: memref<64x1024xf32, #tpu.memory_space<vmem>>, %arg2: memref<64x1024xi8, #tpu.memory_space<vmem>>) attributes {dimension_semantics = [#tpu.dimension_semantics<parallel>], iteration_bounds = array<i64: 2>, scalar_prefetch = 0 : i64, scratch_operands = 0 : i64, tpu.core_type = #tpu.core_type<tc>, window_params = [{transform_indices = @transform_0, window_bounds = array<i64: 64, 1024>}, {transform_indices = @transform_1, window_bounds = array<i64: 64, 1024>}]} {
    %c0 = arith.constant 0 : index
    %c0_0 = arith.constant 0 : index
    %0 = vector.load %arg1[%c0, %c0_0] : memref<64x1024xf32, #tpu.memory_space<vmem>>, vector<64x1024xf32>
    %cst = arith.constant -2.000000e+00 : f32
    %1 = vector.broadcast %cst : f32 to vector<64x1024xf32>
    %2 = arith.cmpf olt, %0, %1 : vector<64x1024xf32>
    %3 = arith.extui %2 : vector<64x1024xi1> to vector<64x1024xi8>
    %c0_1 = arith.constant 0 : index
    %c0_2 = arith.constant 0 : index
    %4 = vector.load %arg2[%c0_1, %c0_2] : memref<64x1024xi8, #tpu.memory_space<vmem>>, vector<64x1024xi8>
    tpu.vector_store %arg2[%c0_1, %c0_2], %3 {strides = array<i32>} : memref<64x1024xi8, #tpu.memory_space<vmem>>, vector<64x1024xi8>,
    return
  }
  func.func @transform_0(%arg0: i32) -> (i32, i32) {
    %c0_i32 = arith.constant 0 : i32
    %c0_i32_0 = arith.constant 0 : i32
    return %arg0, %c0_i32 : i32, i32
  }
  func.func @transform_1(%arg0: i32) -> (i32, i32) {
    %c0_i32 = arith.constant 0 : i32
    %c0_i32_0 = arith.constant 0 : i32
    return %arg0, %c0_i32 : i32, i32
  }
}

</mosaic_0001>

<bundles_post_ra>
// kernel: tpu_custom_call.1
= control target key start
LH: loop header
LB: loop body
LE: loop exit
PB: predicated region body
PF: predicated region fallthrough
CT: control target
= control target key end

     0   :  { %6 = vsyncpa [#allocation3], 0  ;;  %s890_s0 = inlined_call_operand.hbm [shape: f32[128,1024], index: 0, kind: input, shape index: {}]   ;;  %s891_s1 = inlined_call_operand.hbm [shape: s8[128,1024], index: 1, kind: output, shape index: {}]  }
   0x1   :  { %8 = vsyncpa [#allocation3 + $0x1], 0 }
   0x2   :  { %9 = vsyncpa [#allocation4], 0 }
   0x3   :  { %11 = vsyncpa [#allocation4 + $0x1], 0  ;;  %s622_s6 = smov 0   ;;  %s624_s7 = smov 0  }
   0x4   :  { %s626_s8 = smov 0   ;;  %s628_s9 = smov 0  }
   0x5 LB: > { %s643_s10 = sadd.s32 4294967295, %s603_s9   ;;  %s436_s11 = sadd.s32 4294967294, %s603_s9   ;;  %s603_s9 = sphi %s628_s9, %s904_s9   ;;  %s599_s8 = sphi %s626_s8, %s903_s8   ;;  %s595_s7 = sphi %s624_s7, %s902_s7   ;;  %s591_s6 = sphi %s622_s6, %s901_s6  }
   0x6   : > { %s647_s12 = sadd.s32 1, %s603_s9   ;;  %s24_s13 = sadd.s32 1, %s599_s8 }
   0x7   : > { %s21_s14 = ssub.s32 %s603_s9, %s647_s12  ;;  %p31_p0 = scmp.ne.s32.totalorder %s599_s8, %s595_s7 }
   0x8   : > { %p22_p1 = scmp.eq.s32.totalorder %s21_s14, 0  ;;  %p32_p2 = scmp.eq.s32.totalorder %s603_s9, 0 }
   0x9   : > { %p37_p3 = scmp.ne.s32.totalorder %s595_s7, %s591_s6  ;;  %p38_p4 = scmp.eq.s32.totalorder %s643_s10, 0 }
   0xa   : > { %s659_s15 = scalar_select %p22_p1, %s599_s8, %s24_s13  }
   0xb   : > { %p661_p5 = por %p32_p2, %p31_p0  ;;  %p665_p6 = por %p38_p4, %p37_p3 }
   0xc   : > { %p61_p7 = scmp.eq.s32.totalorder %s643_s10, 1  ;;  %p67_p8 = scmp.eq.s32.totalorder %s436_s11, 1 }
   0xd   : > { %p468_p10 = scmp.lt.s32.totalorder %s603_s9, 2  ;;  %s87_s20 = sand.u32 1, %s599_s8  }
   0xe   : > { %p672_p11 = por %p61_p7, %p31_p0  ;;  %p676_p12 = por %p67_p8, %p37_p3 }
   0xf   : > { %s453_s21 = sshll.u32 %s603_s9, 13  ;;  %s439_s22 = sshll.u32 %s87_s20, 9 }
  0x10   : > { %s895_s18 = scalar_select %p672_p11, 1, 0 }
  0x11   : > { %s896_s19 = scalar_select %p676_p12, 1, 0 }
  0x12   : > { %s685_s25 = scalar_lea.hbm %s890_s0, %s453_s21  ;;  %s91_s26 = scalar_lea.vmem [#allocation2], %s439_s22 }
  0x13   : > { %s99_s27 = sshll.u32 %s91_s26, 4  ;;  %p689_p13 = pnand %p468_p10, %p661_p5  ;;  %s693_s27 = int_to_ptr.vmem [resolvable:$true] %s99_s27 }
  0x14   : > { %s695_s29 = scalar_lea.sflag [#allocation3], %s87_s20  ;;  %s507_s30 = scalar_lea.hbm %s685_s25, 8192 }
  0x15   : > { %p508_p0 = scmp.ne.s32.totalorder %s685_s25, %s507_s30  ;;  %p509_p1 = pneg %p689_p13 }
  0x16   : > { %s512_s4 = scalar_lea.hbm %s890_s0, 16384  ;;  %p513_p4 = scmp.lt.u32.totalorder %s685_s25, %s890_s0 }
  0x17   : > { %p510_p2 = pnand %p509_p1, %p508_p0  ;;  %p514_p5 = scmp.lt.u32.totalorder %s512_s4, %s507_s30 }
  0x18   : > { %p516_p8 = scmp.lt.u32.totalorder %s507_s30, %s685_s25 }
  0x19   : > { %p511_p3 = pneg %p510_p2  ;;  %p515_p7 = por %p514_p5, %p513_p4 }
  0x1b   : > { %p517_p10 = por %p516_p8, %p515_p7 }
  0x1d   : > { %p518_p9 = pnand %p517_p10, %p511_p3 }
  0x1f   : > { %521 = shalt.err (!%p518_p9)
}
  0x20   : > { %s522_s13 = scalar_lea.vmem %s693_s27, 8192  ;;  %s605_s14 = smov [#allocation2]  }
  0x21   : > { %p523_p0 = scmp.ne.s32.totalorder %s693_s27, %s522_s13  ;;  %s527_s16 = sshll.u32 %s605_s14, 4  ;;  %s528_s16 = int_to_ptr.vmem [resolvable:$false] %s527_s16 }
  0x22   : > { %s529_s20 = scalar_lea.vmem %s528_s16, 16384  ;;  %p530_p11 = scmp.lt.s32.totalorder %s693_s27, %s528_s16 }
  0x23   : > { %p525_p2 = pnand %p523_p0, %p509_p1  ;;  %p531_p4 = scmp.lt.s32.totalorder %s529_s20, %s522_s13 }
  0x25   : > { %p526_p12 = pneg %p525_p2  ;;  %p532_p5 = por %p531_p4, %p530_p11 }
  0x27   : > { %p533_p7 = pnand %p532_p5, %p526_p12 }
  0x29   : > { %536 = shalt.err (!%p533_p7)
}
  0x2a   : > { %s606_s21 = smov 1024   ;;  %s607_s22 = smov 64  }
  0x2b   : > { %463 = dma.hbm_to_vmem [thread:$0]  (!%p689_p13), %s685_s25, 8192, %s693_s27, %s695_s29, %s606_s21, %s606_s21, %s607_s22  }
  0x2c   : > { %p443_p9 = scmp.ge.s32.totalorder %s603_s9, 1  ;;  %p107_p1 = scmp.lt.s32.totalorder %s603_s9, 3 }
  0x2e   : > { %p108_p3 = pnand %p443_p9, %p107_p1 }
  0x2f   : > { %s726_s23 = sand.u32 (!%p108_p3), 1, %s595_s7  }
  0x30   : > { %111 = sbr.rel (%p108_p3) target bundleno = 123 (0x7b), region = 24  ;;  %s444_s24 = sshll.u32 (!%p108_p3), %s726_s23, 9 }
  0x31   : > { %s114_s26 = scalar_lea.sflag (!%p108_p3), [#allocation3], %s726_s23  ;;  %s730_s30 = scalar_lea.vmem (!%p108_p3), [#allocation2], %s444_s24 }
  0x37   : > { %582 = dma.done.wait (%p665_p6), %s114_s26, 8192  }
  0x38   : > { %584 = vsyncadd (%p665_p6), %s114_s26, 4294959104  ;;  %s445_s25 = sshll.u32 %s726_s23, 7  ;;  %v140_v0 = vld [vmem:[%s730_s30] sm:$0xff]  ;;  %v141_v4 = vld [vmem:[%s730_s30 + $0x8] sm:$0xff]  ;;  %v608_v12 = vmov 0   ;;  %s455_s27 = sshll.u32 %s643_s10, 11 }
  0x39   : > { %v148_v1 = vld [vmem:[%s730_s30 + $0x40] sm:$0xff]  ;;  %vm204_vm0 = vcmp.lt.f32.partialorder %v140_v0, -2.0  ;;  %v149_v5 = vld [vmem:[%s730_s30 + $0x48] sm:$0xff]  ;;  %vm205_vm5 = vcmp.lt.f32.partialorder %v141_v4, -2.0  ;;  %v142_v8 = vld [vmem:[%s730_s30 + $0x10] sm:$0xff]  ;;  %s754_s17 = scalar_lea.vmem [#allocation5], %s445_s25  ;;  %s842_s3 = scalar_lea.hbm %s891_s1, %s455_s27 }
  0x3a   : > { %v156_v2 = vld [vmem:[%s730_s30 + $0x80] sm:$0xff]  ;;  %vm212_vm1 = vcmp.lt.f32.partialorder %v148_v1, -2.0  ;;  %v157_v6 = vld [vmem:[%s730_s30 + $0x88] sm:$0xff]  ;;  %vm213_vm6 = vcmp.lt.f32.partialorder %v149_v5, -2.0  ;;  %v150_v9 = vld [vmem:[%s730_s30 + $0x50] sm:$0xff]  ;;  %vm206_vm12 = vcmp.lt.f32.partialorder %v142_v8, -2.0 }
  0x3b   : > { %v164_v3 = vld [vmem:[%s730_s30 + $0xc0] sm:$0xff]  ;;  %vm220_vm2 = vcmp.lt.f32.partialorder %v156_v2, -2.0  ;;  %vm268_vm4 = vmpackc.low %vm212_vm1, %vm204_vm0  ;;  %v165_v7 = vld [vmem:[%s730_s30 + $0xc8] sm:$0xff]  ;;  %vm221_vm8 = vcmp.lt.f32.partialorder %v157_v6, -2.0  ;;  %vm214_vm13 = vcmp.lt.f32.partialorder %v150_v9, -2.0  ;;  %s363_s28 = sshll.u32 %s754_s17, 4  ;;  %s844_s28 = int_to_ptr.vmem [resolvable:$true] %s363_s28 }
  0x3c   : > { %vm228_vm3 = vcmp.lt.f32.partialorder %v164_v3, -2.0  ;;  %vm229_vm9 = vcmp.lt.f32.partialorder %v165_v7, -2.0  ;;  %v158_v10 = vld [vmem:[%s730_s30 + $0x90] sm:$0xff]  ;;  %vm271_vm11 = vmpackc.low %vm213_vm6, %vm205_vm5  ;;  %v143_v14 = vld [vmem:[%s730_s30 + $0x18] sm:$0xff]  ;;  %s349_s10 = scalar_lea.sflag [#allocation4], %s726_s23  ;;  %s537_s4 = scalar_lea.vmem %s844_s28, 2048 }
  0x3d   : > { %vm269_vm7 = vmpackc.low %vm228_vm3, %vm220_vm2  ;;  %v166_v11 = vld [vmem:[%s730_s30 + $0xd0] sm:$0xff]  ;;  %v151_v15 = vld [vmem:[%s730_s30 + $0x58] sm:$0xff]  ;;  %vm222_vm15 = vcmp.lt.f32.partialorder %v158_v10, -2.0  ;;  %vm207_vm3 = vcmp.lt.f32.partialorder %v143_v14, -2.0  ;;  %p538_p6 = scmp.ne.s32.totalorder %s844_s28, %s537_s4  ;;  %p898_p11 = scmp.ne.s32.totalorder %s895_s18, 0 }
  0x3e   : > { %vm270_vm10 = vmpackc.even %vm269_vm7, %vm268_vm4  ;;  %vm230_vm0 = vcmp.lt.f32.partialorder %v166_v11, -2.0  ;;  %v159_v16 = vld [vmem:[%s730_s30 + $0x98] sm:$0xff]  ;;  %vm215_vm4 = vcmp.lt.f32.partialorder %v151_v15, -2.0  ;;  %v144_v19 = vld [vmem:[%s730_s30 + $0x20] sm:$0xff]  ;;  %s609_s5 = smov [#allocation5]  }
  0x3f   : > { %v316_v13 = vsel %vm270_vm10, 16843009, %v608_v12  ;;  %vm272_vm14 = vmpackc.low %vm229_vm9, %vm221_vm8  ;;  %v167_v17 = vld [vmem:[%s730_s30 + $0xd8] sm:$0xff]  ;;  %v152_v20 = vld [vmem:[%s730_s30 + $0x60] sm:$0xff]  ;;  %vm223_vm6 = vcmp.lt.f32.partialorder %v159_v16, -2.0  ;;  %vm208_vm10 = vcmp.lt.f32.partialorder %v144_v19, -2.0  ;;  %p539_p12 = pnand %p538_p6, %p898_p11 }
  0x40   : > { %332 = vst [vmem:[%s754_s17] sm:$0xff] %v316_v13  ;;  %vm273_vm1 = vmpackc.even %vm272_vm14, %vm271_vm11  ;;  %vm231_vm7 = vcmp.lt.f32.partialorder %v167_v17, -2.0  ;;  %v160_v21 = vld [vmem:[%s730_s30 + $0xa0] sm:$0xff]  ;;  %vm216_vm11 = vcmp.lt.f32.partialorder %v152_v20, -2.0  ;;  %v145_v24 = vld [vmem:[%s730_s30 + $0x28] sm:$0xff]  ;;  %s541_s11 = sshll.u32 %s609_s5, 4  ;;  %s542_s11 = int_to_ptr.vmem [resolvable:$false] %s541_s11 }
  0x41   : > { %v317_v18 = vsel %vm273_vm1, 16843009, %v608_v12  ;;  %vm274_vm2 = vmpackc.low %vm214_vm13, %vm206_vm12  ;;  %v168_v22 = vld [vmem:[%s730_s30 + $0xe0] sm:$0xff]  ;;  %v153_v25 = vld [vmem:[%s730_s30 + $0x68] sm:$0xff]  ;;  %vm224_vm13 = vcmp.lt.f32.partialorder %v160_v21, -2.0  ;;  %vm209_vm1 = vcmp.lt.f32.partialorder %v145_v24, -2.0  ;;  %p540_p13 = pneg %p539_p12  ;;  %p544_p8 = scmp.lt.s32.totalorder %s844_s28, %s542_s11 }
  0x42   : > { %333 = vst [vmem:[%s754_s17 + $0x8] sm:$0xff] %v317_v18  ;;  %vm275_vm5 = vmpackc.low %vm230_vm0, %vm222_vm15  ;;  %vm232_vm14 = vcmp.lt.f32.partialorder %v168_v22, -2.0  ;;  %v161_v26 = vld [vmem:[%s730_s30 + $0xa8] sm:$0xff]  ;;  %v146_v29 = vld [vmem:[%s730_s30 + $0x30] sm:$0xff]  ;;  %s543_s13 = scalar_lea.vmem %s542_s11, 4096 }
  0x43   : > { %vm276_vm8 = vmpackc.even %vm275_vm5, %vm274_vm2  ;;  %v169_v27 = vld [vmem:[%s730_s30 + $0xe8] sm:$0xff]  ;;  %vm217_vm2 = vcmp.lt.f32.partialorder %v153_v25, -2.0  ;;  %v154_v30 = vld [vmem:[%s730_s30 + $0x70] sm:$0xff]  ;;  %p545_p10 = scmp.lt.s32.totalorder %s543_s13, %s537_s4 }
  0x44   : > { %v318_v23 = vsel %vm276_vm8, 16843009, %v608_v12  ;;  %vm277_vm9 = vmpackc.low %vm215_vm4, %vm207_vm3  ;;  %vm225_vm4 = vcmp.lt.f32.partialorder %v161_v26, -2.0  ;;  %vm233_vm5 = vcmp.lt.f32.partialorder %v169_v27, -2.0  ;;  %v162_v31 = vld [vmem:[%s730_s30 + $0xb0] sm:$0xff]  ;;  %vm210_vm8 = vcmp.lt.f32.partialorder %v146_v29, -2.0 }
  0x45   : > { %334 = vst [vmem:[%s754_s17 + $0x10] sm:$0xff] %v318_v23  ;;  %vm278_vm12 = vmpackc.low %vm231_vm7, %vm223_vm6  ;;  %v170_v32 = vld [vmem:[%s730_s30 + $0xf0] sm:$0xff]  ;;  %v147_v34 = vld [vmem:[%s730_s30 + $0x38] sm:$0xff]  ;;  %p546_p0 = por %p545_p10, %p544_p8 }
  0x46   : > { %vm279_vm15 = vmpackc.even %vm278_vm12, %vm277_vm9  ;;  %vm218_vm9 = vcmp.lt.f32.partialorder %v154_v30, -2.0  ;;  %v155_v35 = vld [vmem:[%s730_s30 + $0x78] sm:$0xff]  ;;  %vm234_vm12 = vcmp.lt.f32.partialorder %v170_v32, -2.0  ;;  %v172_v39 = vld [vmem:[%s730_s30 + $0x100] sm:$0xff] }
  0x47   : > { %v319_v28 = vsel %vm279_vm15, 16843009, %v608_v12  ;;  %vm280_vm0 = vmpackc.low %vm216_vm11, %vm208_vm10  ;;  %vm226_vm11 = vcmp.lt.f32.partialorder %v162_v31, -2.0  ;;  %v163_v36 = vld [vmem:[%s730_s30 + $0xb8] sm:$0xff]  ;;  %vm211_vm15 = vcmp.lt.f32.partialorder %v147_v34, -2.0  ;;  %v180_v40 = vld [vmem:[%s730_s30 + $0x140] sm:$0xff]  ;;  %p547_p2 = pnand %p546_p0, %p540_p13 }
  0x48   : > { %335 = vst [vmem:[%s754_s17 + $0x18] sm:$0xff] %v319_v28  ;;  %vm281_vm3 = vmpackc.low %vm232_vm14, %vm224_vm13  ;;  %v171_v37 = vld [vmem:[%s730_s30 + $0xf8] sm:$0xff]  ;;  %v188_v41 = vld [vmem:[%s730_s30 + $0x180] sm:$0xff] }
  0x49   : > { %vm282_vm6 = vmpackc.even %vm281_vm3, %vm280_vm0  ;;  %vm219_vm0 = vcmp.lt.f32.partialorder %v155_v35, -2.0  ;;  %vm235_vm3 = vcmp.lt.f32.partialorder %v171_v37, -2.0  ;;  %v196_v42 = vld [vmem:[%s730_s30 + $0x1c0] sm:$0xff]  ;;  %v173_v44 = vld [vmem:[%s730_s30 + $0x108] sm:$0xff] }
  0x4a   : > { %v320_v33 = vsel %vm282_vm6, 16843009, %v608_v12  ;;  %vm283_vm7 = vmpackc.low %vm217_vm2, %vm209_vm1  ;;  %vm227_vm2 = vcmp.lt.f32.partialorder %v163_v36, -2.0  ;;  %vm236_vm6 = vcmp.lt.f32.partialorder %v172_v39, -2.0  ;;  %v181_v45 = vld [vmem:[%s730_s30 + $0x148] sm:$0xff]  ;;  %v174_v49 = vld [vmem:[%s730_s30 + $0x110] sm:$0xff] }
  0x4b   : > { %336 = vst [vmem:[%s754_s17 + $0x20] sm:$0xff] %v320_v33  ;;  %vm284_vm10 = vmpackc.low %vm233_vm5, %vm225_vm4  ;;  %v189_v46 = vld [vmem:[%s730_s30 + $0x188] sm:$0xff]  ;;  %v182_v50 = vld [vmem:[%s730_s30 + $0x150] sm:$0xff] }
  0x4c   : > { %vm285_vm13 = vmpackc.even %vm284_vm10, %vm283_vm7  ;;  %vm244_vm7 = vcmp.lt.f32.partialorder %v180_v40, -2.0  ;;  %vm260_vm10 = vcmp.lt.f32.partialorder %v196_v42, -2.0  ;;  %v197_v47 = vld [vmem:[%s730_s30 + $0x1c8] sm:$0xff]  ;;  %v190_v51 = vld [vmem:[%s730_s30 + $0x190] sm:$0xff] }
  0x4d   : > { %v321_v38 = vsel %vm285_vm13, 16843009, %v608_v12  ;;  %vm286_vm14 = vmpackc.low %vm218_vm9, %vm210_vm8  ;;  %vm252_vm9 = vcmp.lt.f32.partialorder %v188_v41, -2.0  ;;  %vm237_vm13 = vcmp.lt.f32.partialorder %v173_v44, -2.0  ;;  %v198_v52 = vld [vmem:[%s730_s30 + $0x1d0] sm:$0xff]  ;;  %v175_v54 = vld [vmem:[%s730_s30 + $0x118] sm:$0xff] }
  0x4e   : > { %337 = vst [vmem:[%s754_s17 + $0x28] sm:$0xff] %v321_v38  ;;  %vm287_vm1 = vmpackc.low %vm234_vm12, %vm226_vm11  ;;  %v183_v55 = vld [vmem:[%s730_s30 + $0x158] sm:$0xff]  ;;  %v176_v59 = vld [vmem:[%s730_s30 + $0x120] sm:$0xff] }
  0x4f   : > { %vm288_vm4 = vmpackc.even %vm287_vm1, %vm286_vm14  ;;  %vm245_vm14 = vcmp.lt.f32.partialorder %v181_v45, -2.0  ;;  %vm261_vm1 = vcmp.lt.f32.partialorder %v197_v47, -2.0  ;;  %v191_v56 = vld [vmem:[%s730_s30 + $0x198] sm:$0xff]  ;;  %v184_v60 = vld [vmem:[%s730_s30 + $0x160] sm:$0xff] }
  0x50   : > { %v322_v43 = vsel %vm288_vm4, 16843009, %v608_v12  ;;  %vm289_vm5 = vmpackc.low %vm219_vm0, %vm211_vm15  ;;  %vm253_vm0 = vcmp.lt.f32.partialorder %v189_v46, -2.0  ;;  %vm238_vm4 = vcmp.lt.f32.partialorder %v174_v49, -2.0  ;;  %v199_v57 = vld [vmem:[%s730_s30 + $0x1d8] sm:$0xff]  ;;  %v192_v61 = vld [vmem:[%s730_s30 + $0x1a0] sm:$0xff] }
  0x51   : > { %338 = vst [vmem:[%s754_s17 + $0x30] sm:$0xff] %v322_v43  ;;  %vm290_vm8 = vmpackc.low %vm235_vm3, %vm227_vm2  ;;  %v200_v62 = vld [vmem:[%s730_s30 + $0x1e0] sm:$0xff]  ;;  %v177_v0 = vld [vmem:[%s730_s30 + $0x128] sm:$0xff] }
  0x52   : > { %vm291_vm11 = vmpackc.even %vm290_vm8, %vm289_vm5  ;;  %vm246_vm5 = vcmp.lt.f32.partialorder %v182_v50, -2.0  ;;  %vm262_vm8 = vcmp.lt.f32.partialorder %v198_v52, -2.0  ;;  %v185_v1 = vld [vmem:[%s730_s30 + $0x168] sm:$0xff]  ;;  %v178_v5 = vld [vmem:[%s730_s30 + $0x130] sm:$0xff] }
  0x53   : > { %v323_v48 = vsel %vm291_vm11, 16843009, %v608_v12  ;;  %vm292_vm12 = vmpackc.low %vm244_vm7, %vm236_vm6  ;;  %vm254_vm7 = vcmp.lt.f32.partialorder %v190_v51, -2.0  ;;  %vm239_vm11 = vcmp.lt.f32.partialorder %v175_v54, -2.0  ;;  %v193_v2 = vld [vmem:[%s730_s30 + $0x1a8] sm:$0xff]  ;;  %v186_v6 = vld [vmem:[%s730_s30 + $0x170] sm:$0xff] }
  0x54   : > { %339 = vst [vmem:[%s754_s17 + $0x38] sm:$0xff] %v323_v48  ;;  %vm293_vm15 = vmpackc.low %vm260_vm10, %vm252_vm9  ;;  %v201_v3 = vld [vmem:[%s730_s30 + $0x1e8] sm:$0xff]  ;;  %v194_v7 = vld [vmem:[%s730_s30 + $0x1b0] sm:$0xff] }
  0x55   : > { %vm294_vm2 = vmpackc.even %vm293_vm15, %vm292_vm12  ;;  %vm247_vm12 = vcmp.lt.f32.partialorder %v183_v55, -2.0  ;;  %vm263_vm15 = vcmp.lt.f32.partialorder %v199_v57, -2.0  ;;  %v202_v8 = vld [vmem:[%s730_s30 + $0x1f0] sm:$0xff]  ;;  %v179_v10 = vld [vmem:[%s730_s30 + $0x138] sm:$0xff] }
  0x56   : > { %v324_v53 = vsel %vm294_vm2, 16843009, %v608_v12  ;;  %vm295_vm3 = vmpackc.low %vm245_vm14, %vm237_vm13  ;;  %vm255_vm14 = vcmp.lt.f32.partialorder %v191_v56, -2.0  ;;  %vm240_vm2 = vcmp.lt.f32.partialorder %v176_v59, -2.0  ;;  %v187_v11 = vld [vmem:[%s730_s30 + $0x178] sm:$0xff] }
  0x57   : > { %340 = vst [vmem:[%s754_s17 + $0x40] sm:$0xff] %v324_v53  ;;  %vm296_vm6 = vmpackc.low %vm261_vm1, %vm253_vm0  ;;  %v195_v13 = vld [vmem:[%s730_s30 + $0x1b8] sm:$0xff] }
  0x58   : > { %vm297_vm9 = vmpackc.even %vm296_vm6, %vm295_vm3  ;;  %vm248_vm3 = vcmp.lt.f32.partialorder %v184_v60, -2.0  ;;  %vm264_vm6 = vcmp.lt.f32.partialorder %v200_v62, -2.0  ;;  %v203_v14 = vld [vmem:[%s730_s30 + $0x1f8] sm:$0xff] }
  0x59   : > { %v325_v58 = vsel %vm297_vm9, 16843009, %v608_v12  ;;  %vm298_vm10 = vmpackc.low %vm246_vm5, %vm238_vm4  ;;  %vm256_vm5 = vcmp.lt.f32.partialorder %v192_v61, -2.0  ;;  %vm241_vm9 = vcmp.lt.f32.partialorder %v177_v0, -2.0 }
  0x5a   : > { %341 = vst [vmem:[%s754_s17 + $0x48] sm:$0xff] %v325_v58  ;;  %vm299_vm13 = vmpackc.low %vm262_vm8, %vm254_vm7 }
  0x5b   : > { %vm300_vm0 = vmpackc.even %vm299_vm13, %vm298_vm10  ;;  %vm249_vm10 = vcmp.lt.f32.partialorder %v185_v1, -2.0  ;;  %vm265_vm13 = vcmp.lt.f32.partialorder %v201_v3, -2.0 }
  0x5c   : > { %v326_v63 = vsel %vm300_vm0, 16843009, %v608_v12  ;;  %vm301_vm1 = vmpackc.low %vm247_vm12, %vm239_vm11  ;;  %vm257_vm12 = vcmp.lt.f32.partialorder %v193_v2, -2.0  ;;  %vm242_vm0 = vcmp.lt.f32.partialorder %v178_v5, -2.0 }
  0x5d   : > { %342 = vst [vmem:[%s754_s17 + $0x50] sm:$0xff] %v326_v63  ;;  %vm302_vm4 = vmpackc.low %vm263_vm15, %vm255_vm14 }
  0x5e   : > { %vm303_vm7 = vmpackc.even %vm302_vm4, %vm301_vm1  ;;  %vm250_vm1 = vcmp.lt.f32.partialorder %v186_v6, -2.0  ;;  %vm266_vm4 = vcmp.lt.f32.partialorder %v202_v8, -2.0 }
  0x5f   : > { %v327_v4 = vsel %vm303_vm7, 16843009, %v608_v12  ;;  %vm304_vm8 = vmpackc.low %vm248_vm3, %vm240_vm2  ;;  %vm258_vm3 = vcmp.lt.f32.partialorder %v194_v7, -2.0  ;;  %vm243_vm7 = vcmp.lt.f32.partialorder %v179_v10, -2.0 }
  0x60   : > { %343 = vst [vmem:[%s754_s17 + $0x58] sm:$0xff] %v327_v4  ;;  %vm305_vm11 = vmpackc.low %vm264_vm6, %vm256_vm5 }
  0x61   : > { %vm306_vm14 = vmpackc.even %vm305_vm11, %vm304_vm8  ;;  %vm251_vm8 = vcmp.lt.f32.partialorder %v187_v11, -2.0  ;;  %vm267_vm11 = vcmp.lt.f32.partialorder %v203_v14, -2.0 }
  0x62   : > { %v328_v9 = vsel %vm306_vm14, 16843009, %v608_v12  ;;  %vm307_vm15 = vmpackc.low %vm249_vm10, %vm241_vm9  ;;  %vm259_vm10 = vcmp.lt.f32.partialorder %v195_v13, -2.0 }
  0x63   : > { %344 = vst [vmem:[%s754_s17 + $0x60] sm:$0xff] %v328_v9  ;;  %vm308_vm2 = vmpackc.low %vm265_vm13, %vm257_vm12 }
  0x64   : > { %vm309_vm5 = vmpackc.even %vm308_vm2, %vm307_vm15 }
  0x65   : > { %v329_v15 = vsel %vm309_vm5, 16843009, %v608_v12  ;;  %vm310_vm6 = vmpackc.low %vm250_vm1, %vm242_vm0 }
  0x66   : > { %345 = vst [vmem:[%s754_s17 + $0x68] sm:$0xff] %v329_v15  ;;  %vm311_vm9 = vmpackc.low %vm266_vm4, %vm258_vm3 }
  0x67   : > { %vm312_vm12 = vmpackc.even %vm311_vm9, %vm310_vm6 }
  0x68   : > { %v330_v16 = vsel %vm312_vm12, 16843009, %v608_v12  ;;  %vm313_vm13 = vmpackc.low %vm251_vm8, %vm243_vm7 }
  0x69   : > { %346 = vst [vmem:[%s754_s17 + $0x70] sm:$0xff] %v330_v16  ;;  %vm314_vm14 = vmpackc.low %vm267_vm11, %vm259_vm10 }
  0x6a   : > { %vm315_vm15 = vmpackc.even %vm314_vm14, %vm313_vm13 }
  0x6b   : > { %v331_v17 = vsel %vm315_vm15, 16843009, %v608_v12 }
  0x6c   : > { %347 = vst [vmem:[%s754_s17 + $0x78] sm:$0xff] %v331_v17 }
  0x6d   : > { %550 = shalt.err (!%p547_p2)
}
  0x6e   : > { %s551_s14 = scalar_lea.hbm %s842_s3, 2048  ;;  %s555_s21 = scalar_lea.hbm %s891_s1, 4096 }
  0x6f   : > { %p552_p4 = scmp.ne.s32.totalorder %s842_s3, %s551_s14  ;;  %p556_p9 = scmp.lt.u32.totalorder %s842_s3, %s891_s1 }
  0x70   : > { %p557_p1 = scmp.lt.u32.totalorder %s555_s21, %s551_s14  ;;  %p559_p6 = scmp.lt.u32.totalorder %s551_s14, %s842_s3 }
  0x71   : > { %p553_p5 = pnand %p552_p4, %p898_p11 }
  0x72   : > { %p558_p3 = por %p557_p1, %p556_p9 }
  0x73   : > { %p554_p7 = pneg %p553_p5 }
  0x74   : > { %p560_p12 = por %p559_p6, %p558_p3 }
  0x76   : > { %p561_p13 = pnand %p560_p12, %p554_p7 }
  0x78   : > { %564 = shalt.err (!%p561_p13)
}
  0x79   : > { %s610_s26 = smov 1024   ;;  %s611_s30 = smov 64  }
  0x7a   : > { %458 = dma.vmem_to_hbm [thread:$0]  (%p898_p11), %s844_s28, 2048, %s842_s3, %s349_s10, %s610_s26, %s610_s26, %s611_s30  }
  0x7b PF: > { %s378_s25 = sand.u32 1, %s591_s6   ;;  %p899_p8 = scmp.ne.s32.totalorder %s896_s19, 0 }
  0x7c   : > { %p900_p10 = scmp.ge.s32.totalorder %s603_s9, 2  ;;  %s379_s17 = scalar_lea.sflag [#allocation4], %s378_s25 }
  0x7e   : > { %p465_p0 = pnand %p900_p10, %p899_p8 }
  0x80   : > { %586 = dma.done.wait (!%p465_p0), %s379_s17, 2048  }
  0x81   : > { %588 = vsyncadd (!%p465_p0), %s379_s17, 4294965248  ;;  %p14_p2 = scmp.ge.s32.totalorder %s647_s12, 4   ;;  %s901_s6 = smov %s595_s7 }
  0x82   : > { %s902_s7 = smov %s599_s8  ;;  %s903_s8 = smov %s659_s15 }
  0x83   : > { %s904_s9 = smov %s647_s12  ;;  %16 = sbr.rel (!%p14_p2) target bundleno = 5 (0x5), region = 69 }
  0x8a   :  { %384 = vsyncpa [#allocation3], 1 }
  0x8b   :  { %386 = vsyncpa [#allocation3 + $0x1], 1 }
  0x8c   :  { %387 = vsyncpa [#allocation4], 1 }
  0x8d   :  { %389 = vsyncpa [#allocation4 + $0x1], 1 }

</bundles_post_ra>
